<compile_context>
chip_gen: v7x
topology: tpu7x:2x2x1
jax: 0.10.0
libtpu: 0.0.40
codegen_flags: <defaults>
</compile_context>

<pallas_src>
import math
import functools

import jax
import jax.numpy as jnp
from jax.experimental import pallas as pl
from jax.experimental.pallas import tpu as pltpu

LN_EPS = 1e-5  # torch.nn.LayerNorm default


def _layernorm_f32(x, gamma, beta):
    # x: (..., D) any float dtype; gamma/beta: (1, D). Biased variance, fp32 math.
    x = x.astype(jnp.float32)
    mu = jnp.mean(x, axis=-1, keepdims=True)
    var = jnp.mean((x - mu) ** 2, axis=-1, keepdims=True)
    return (x - mu) * jax.lax.rsqrt(var + LN_EPS) * gamma + beta


def perceiver_attention_kernel(
    x_ref, lat_ref, g1_ref, b1_ref, g2_ref, b2_ref,
    wq_ref, wkv_ref, wout_ref, out_ref,
    kvn_ref, latn_ref, acc_ref,
    *, heads, dim_head, n1, n2,
):
    # x_ref:    (Bt, n1, D)    image features (this batch block)
    # lat_ref:  (Bt, n2, D)    latent features
    # wq_ref:   (1, D, dh)     this head's query weight (pre-transposed)
    # wkv_ref:  (1, D, 2*dh)   this head's fused key/value weight
    # wout_ref: (1, dh, D)     this head's slice of the output projection
    # kvn_ref:  (Bt, n1+n2, D) bf16 scratch: LayerNormed concat(x, latents)
    # latn_ref: (Bt, n2, D)    bf16 scratch: LayerNormed latents
    # acc_ref:  (Bt*n2, D)     fp32 scratch: output accumulator over heads
    h = pl.program_id(1)
    bt = lat_ref.shape[0]
    dh = dim_head
    L = n1 + n2
    D = x_ref.shape[-1]

    # ---- once per batch-block: LayerNorms (fp32) -> bf16 scratch, zero acc ----
    @pl.when(h == 0)
    def _prologue():
        xn = _layernorm_f32(x_ref[...], g1_ref[...], b1_ref[...])     # (Bt, n1, D)
        ln = _layernorm_f32(lat_ref[...], g2_ref[...], b2_ref[...])   # (Bt, n2, D)
        kvn_ref[:, :n1, :] = xn.astype(kvn_ref.dtype)
        kvn_ref[:, n1:, :] = ln.astype(kvn_ref.dtype)
        latn_ref[...] = ln.astype(latn_ref.dtype)
        acc_ref[...] = jnp.zeros_like(acc_ref)

    # ---- per-head projections: bf16 on the MXU, fp32 accumulate ----
    latn2 = latn_ref[...].reshape(bt * n2, D)                         # (Bt*n2, D) bf16
    kvn2 = kvn_ref[...].reshape(bt * L, D)                            # (Bt*L,  D) bf16
    q = jnp.dot(latn2, wq_ref[0], preferred_element_type=jnp.float32)   # (Bt*n2, dh)
    kv = jnp.dot(kvn2, wkv_ref[0], preferred_element_type=jnp.float32)  # (Bt*L, 2dh)

    # softmax scale applied once (scale*scale == 1/sqrt(dh)), in fp32.
    q = (q * (1.0 / math.sqrt(dh))).astype(jnp.bfloat16).reshape(bt, n2, dh)
    k = kv[:, :dh].astype(jnp.bfloat16).reshape(bt, L, dh)
    v = kv[:, dh:].astype(jnp.bfloat16).reshape(bt, L, dh)

    # ---- attention: batched over the fused batch block, fp32 softmax ----
    logits = jnp.einsum('bqd,bkd->bqk', q, k,
                        preferred_element_type=jnp.float32)           # (Bt, n2, L)
    w = jax.nn.softmax(logits, axis=-1)                               # fp32
    o = jnp.einsum('bqk,bkd->bqd', w.astype(jnp.bfloat16), v,
                   preferred_element_type=jnp.float32)                # (Bt, n2, dh)

    # ---- output projection: accumulate this head's contribution ----
    acc_ref[...] += jnp.dot(o.astype(jnp.bfloat16).reshape(bt * n2, dh),
                            wout_ref[0], preferred_element_type=jnp.float32)

    @pl.when(h == heads - 1)
    def _epilogue():
        out_ref[...] = acc_ref[...].reshape(bt, n2, D).astype(out_ref.dtype)


def _pick_block_batch(b, n1, n2, target_rows=256):
    """Largest divisor Bt of b with Bt*(n1+n2) <= ~target and grid length >= 2."""
    rows = n1 + n2
    want = max(1, -(-target_rows // rows))
    best = 1
    for cand in range(1, b + 1):
        if b % cand:
            continue
        if cand > want:
            break
        if (b // cand) >= 2 or b == 1:
            best = cand
    return best


def perceiver_attention(x, latents, params, *, heads, dim_head, block_batch=None):
    b, n1, D = x.shape
    _, n2, _ = latents.shape
    inner = heads * dim_head
    dh = dim_head
    L = n1 + n2
    wdt = jnp.bfloat16

    bt = block_batch if block_batch is not None else _pick_block_batch(b, n1, n2)
    assert b % bt == 0, "block_batch must divide batch"

    g1 = params["g1"].reshape(1, D).astype(jnp.float32)
    b1 = params["b1"].reshape(1, D).astype(jnp.float32)
    g2 = params["g2"].reshape(1, D).astype(jnp.float32)
    b2 = params["b2"].reshape(1, D).astype(jnp.float32)

    # Pre-transpose / pre-split weights in the wrapper (layout plumbing is free
    # here): head-major, contraction dim first, bf16 to halve DMA bytes.
    wq_h = jnp.swapaxes(params["wq"].reshape(heads, dh, D), 1, 2).astype(wdt)   # (H, D, dh)
    wk = params["wkv"][:inner].reshape(heads, dh, D)
    wv = params["wkv"][inner:].reshape(heads, dh, D)
    wkv_h = jnp.swapaxes(jnp.concatenate([wk, wv], axis=1), 1, 2).astype(wdt)   # (H, D, 2dh)
    wout_h = jnp.transpose(params["wout"].reshape(D, heads, dh), (1, 2, 0)).astype(wdt)  # (H, dh, D)

    kernel = functools.partial(
        perceiver_attention_kernel, heads=heads, dim_head=dh, n1=n1, n2=n2)

    itemsize = jnp.dtype(x.dtype).itemsize
    flops = 2 * b * (n2 * D * inner            # q projection
                     + L * D * 2 * inner       # fused k/v projection
                     + heads * n2 * L * dh * 2  # qk^T and attn @ v
                     + n2 * inner * D)         # output projection
    transcendentals = b * heads * n2 * L       # softmax exps
    bytes_accessed = int(
        x.size * itemsize + latents.size * itemsize
        + (b // bt) * 2 * (wq_h.size + wkv_h.size + wout_h.size)   # bf16 weights per batch-block
        + b * n2 * D * itemsize)

    return pl.pallas_call(
        kernel,
        out_shape=jax.ShapeDtypeStruct((b, n2, D), x.dtype),
        grid_spec=pltpu.PrefetchScalarGridSpec(
            num_scalar_prefetch=0,
            grid=(b // bt, heads),
            in_specs=[
                pl.BlockSpec((bt, n1, D), lambda i, h: (i, 0, 0)),      # x
                pl.BlockSpec((bt, n2, D), lambda i, h: (i, 0, 0)),      # latents
                pl.BlockSpec((1, D), lambda i, h: (0, 0)),              # norm1 gamma
                pl.BlockSpec((1, D), lambda i, h: (0, 0)),              # norm1 beta
                pl.BlockSpec((1, D), lambda i, h: (0, 0)),              # norm2 gamma
                pl.BlockSpec((1, D), lambda i, h: (0, 0)),              # norm2 beta
                pl.BlockSpec((1, D, dh), lambda i, h: (h, 0, 0)),       # Wq (head h)
                pl.BlockSpec((1, D, 2 * dh), lambda i, h: (h, 0, 0)),   # Wkv (head h)
                pl.BlockSpec((1, dh, D), lambda i, h: (h, 0, 0)),       # Wout (head h)
            ],
            out_specs=pl.BlockSpec((bt, n2, D), lambda i, h: (i, 0, 0)),
            scratch_shapes=[
                pltpu.VMEM((bt, L, D), jnp.bfloat16),    # normalized concat(x, latents)
                pltpu.VMEM((bt, n2, D), jnp.bfloat16),   # normalized latents
                pltpu.VMEM((bt * n2, D), jnp.float32),   # output accumulator over heads
            ],
        ),
        compiler_params=pltpu.CompilerParams(
            dimension_semantics=("parallel", "arbitrary"),
            vmem_limit_bytes=48 * 1024 * 1024,
        ),
        cost_estimate=pl.CostEstimate(
            flops=int(flops),
            transcendentals=int(transcendentals),
            bytes_accessed=bytes_accessed),
    )(x, latents, g1, b1, g2, b2, wq_h, wkv_h, wout_h)


# ---------------- pure-JAX reference (for correctness check) ----------------
def perceiver_attention_ref(x, latents, params, *, heads, dim_head):
    inner = heads * dim_head

    def ln(t, g, bta):
        mu = jnp.mean(t, axis=-1, keepdims=True)
        var = jnp.mean((t - mu) ** 2, axis=-1, keepdims=True)
        return (t - mu) / jnp.sqrt(var + LN_EPS) * g + bta

    xn = ln(x, params["g1"], params["b1"])
    ln_lat = ln(latents, params["g2"], params["b2"])
    b, l, _ = ln_lat.shape
    q = ln_lat @ params["wq"].T
    kv_in = jnp.concatenate([xn, ln_lat], axis=1)
    kv = kv_in @ params["wkv"].T
    k, v = kv[..., :inner], kv[..., inner:]

    def split_heads(t):
        bs, length, _ = t.shape
        return t.reshape(bs, length, heads, dim_head).transpose(0, 2, 1, 3)

    qh, kh, vh = split_heads(q), split_heads(k), split_heads(v)
    scale = 1.0 / math.sqrt(math.sqrt(dim_head))
    w = (qh * scale) @ jnp.swapaxes(kh * scale, -2, -1)
    w = jax.nn.softmax(w.astype(jnp.float32), axis=-1).astype(w.dtype)
    out = w @ vh
    out = out.transpose(0, 2, 1, 3).reshape(b, l, inner)
    return out @ params["wout"].T


if __name__ == "__main__":
    # Small shapes consistent with the module's forward.
    B, N1, N2, D = 2, 16, 8, 32
    HEADS, DIM_HEAD = 4, 8
    INNER = HEADS * DIM_HEAD

    key = jax.random.PRNGKey(0)
    kx, kl, kq, kkv, ko, kg1, kb1, kg2, kb2 = jax.random.split(key, 9)

    x = jax.random.normal(kx, (B, N1, D), dtype=jnp.float32)
    latents = jax.random.normal(kl, (B, N2, D), dtype=jnp.float32)

    params = {
        "g1": 1.0 + 0.05 * jax.random.normal(kg1, (D,), dtype=jnp.float32),
        "b1": 0.05 * jax.random.normal(kb1, (D,), dtype=jnp.float32),
        "g2": 1.0 + 0.05 * jax.random.normal(kg2, (D,), dtype=jnp.float32),
        "b2": 0.05 * jax.random.normal(kb2, (D,), dtype=jnp.float32),
        "wq": 0.05 * jax.random.normal(kq, (INNER, D), dtype=jnp.float32),
        "wkv": 0.05 * jax.random.normal(kkv, (2 * INNER, D), dtype=jnp.float32),
        "wout": 0.05 * jax.random.normal(ko, (D, INNER), dtype=jnp.float32),
    }

    out = perceiver_attention(x, latents, params, heads=HEADS, dim_head=DIM_HEAD)
    out = jax.block_until_ready(out)

    ref = perceiver_attention_ref(x, latents, params, heads=HEADS, dim_head=DIM_HEAD)
    assert out.shape == (B, N2, D)
    # bf16 matmuls inside the kernel -> loosened tolerance vs fp32 reference.
    assert jnp.allclose(out, ref, atol=1e-2, rtol=1e-2), (
        f"max abs diff {jnp.max(jnp.abs(out - ref))}")

    print("KERNEL_OK")
</pallas_src>

<mosaic_0001>
module attributes {stable_mosaic.version = 11 : i64} {
  func.func @perceiver_attention_kernel(%arg0: i32, %arg1: i32, %arg2: memref<1x16x32xf32, #tpu.memory_space<vmem>>, %arg3: memref<1x8x32xf32, #tpu.memory_space<vmem>>, %arg4: memref<1x32xf32, #tpu.memory_space<vmem>>, %arg5: memref<1x32xf32, #tpu.memory_space<vmem>>, %arg6: memref<1x32xf32, #tpu.memory_space<vmem>>, %arg7: memref<1x32xf32, #tpu.memory_space<vmem>>, %arg8: memref<1x32x8xbf16, #tpu.memory_space<vmem>>, %arg9: memref<1x32x16xbf16, #tpu.memory_space<vmem>>, %arg10: memref<1x8x32xbf16, #tpu.memory_space<vmem>>, %arg11: memref<1x8x32xf32, #tpu.memory_space<vmem>>, %arg12: memref<1x24x32xbf16, #tpu.memory_space<vmem>>, %arg13: memref<1x8x32xbf16, #tpu.memory_space<vmem>>, %arg14: memref<8x32xf32, #tpu.memory_space<vmem>>) attributes {dimension_semantics = [#tpu.dimension_semantics<parallel>, #tpu.dimension_semantics<arbitrary>], iteration_bounds = array<i64: 2, 4>, scalar_prefetch = 0 : i64, scratch_operands = 3 : i64, tpu.core_type = #tpu.core_type<tc>, window_params = [{transform_indices = @transform_0, window_bounds = array<i64: 1, 16, 32>}, {transform_indices = @transform_1, window_bounds = array<i64: 1, 8, 32>}, {pipeline_mode = #tpu.pipeline_mode<synchronous>, transform_indices = @transform_2, window_bounds = array<i64: 1, 32>}, {pipeline_mode = #tpu.pipeline_mode<synchronous>, transform_indices = @transform_3, window_bounds = array<i64: 1, 32>}, {pipeline_mode = #tpu.pipeline_mode<synchronous>, transform_indices = @transform_4, window_bounds = array<i64: 1, 32>}, {pipeline_mode = #tpu.pipeline_mode<synchronous>, transform_indices = @transform_5, window_bounds = array<i64: 1, 32>}, {transform_indices = @transform_6, window_bounds = array<i64: 1, 32, 8>}, {transform_indices = @transform_7, window_bounds = array<i64: 1, 32, 16>}, {transform_indices = @transform_8, window_bounds = array<i64: 1, 8, 32>}, {transform_indices = @transform_9, window_bounds = array<i64: 1, 8, 32>}]} {
    %c0_i32 = arith.constant 0 : i32
    %0 = arith.cmpi eq, %arg1, %c0_i32 : i32
    %1 = arith.extui %0 : i1 to i32
    %c0_i32_0 = arith.constant 0 : i32
    %2 = arith.cmpi ne, %1, %c0_i32_0 : i32
    scf.if %2 {
      %c0_28 = arith.constant 0 : index
      %c0_29 = arith.constant 0 : index
      %c0_30 = arith.constant 0 : index
      %48 = vector.load %arg2[%c0_28, %c0_29, %c0_30] : memref<1x16x32xf32, #tpu.memory_space<vmem>>, vector<1x16x32xf32>
      %c0_31 = arith.constant 0 : index
      %c0_32 = arith.constant 0 : index
      %49 = vector.load %arg4[%c0_31, %c0_32] : memref<1x32xf32, #tpu.memory_space<vmem>>, vector<1x32xf32>
      %c0_33 = arith.constant 0 : index
      %c0_34 = arith.constant 0 : index
      %50 = vector.load %arg5[%c0_33, %c0_34] : memref<1x32xf32, #tpu.memory_space<vmem>>, vector<1x32xf32>
      %cst_35 = arith.constant dense<0.000000e+00> : vector<1x16xf32>
      %51 = vector.multi_reduction <add>, %48, %cst_35 [2] : vector<1x16x32xf32> to vector<1x16xf32>
      %52 = vector.shape_cast %51 : vector<1x16xf32> to vector<1x16x1xf32>
      %cst_36 = arith.constant 3.200000e+01 : f32
      %53 = vector.broadcast %cst_36 : f32 to vector<1x16x1xf32>
      %54 = arith.divf %52, %53 : vector<1x16x1xf32>
      %55 = vector.broadcast %54 : vector<1x16x1xf32> to vector<1x16x32xf32>
      %56 = arith.subf %48, %55 : vector<1x16x32xf32>
      %57 = arith.mulf %56, %56 : vector<1x16x32xf32>
      %cst_37 = arith.constant dense<0.000000e+00> : vector<1x16xf32>
      %58 = vector.multi_reduction <add>, %57, %cst_37 [2] : vector<1x16x32xf32> to vector<1x16xf32>
      %59 = vector.shape_cast %58 : vector<1x16xf32> to vector<1x16x1xf32>
      %cst_38 = arith.constant 3.200000e+01 : f32
      %60 = vector.broadcast %cst_38 : f32 to vector<1x16x1xf32>
      %61 = arith.divf %59, %60 : vector<1x16x1xf32>
      %62 = vector.broadcast %54 : vector<1x16x1xf32> to vector<1x16x32xf32>
      %63 = arith.subf %48, %62 : vector<1x16x32xf32>
      %cst_39 = arith.constant 9.99999974E-6 : f32
      %64 = vector.broadcast %cst_39 : f32 to vector<1x16x1xf32>
      %65 = arith.addf %61, %64 : vector<1x16x1xf32>
      %66 = math.rsqrt %65 : vector<1x16x1xf32>
      %67 = vector.broadcast %66 : vector<1x16x1xf32> to vector<1x16x32xf32>
      %68 = arith.mulf %63, %67 : vector<1x16x32xf32>
      %69 = vector.shape_cast %49 : vector<1x32xf32> to vector<1x1x32xf32>
      %70 = vector.broadcast %69 : vector<1x1x32xf32> to vector<1x16x32xf32>
      %71 = arith.mulf %68, %70 : vector<1x16x32xf32>
      %72 = vector.shape_cast %50 : vector<1x32xf32> to vector<1x1x32xf32>
      %73 = vector.broadcast %72 : vector<1x1x32xf32> to vector<1x16x32xf32>
      %74 = arith.addf %71, %73 : vector<1x16x32xf32>
      %c0_40 = arith.constant 0 : index
      %c0_41 = arith.constant 0 : index
      %c0_42 = arith.constant 0 : index
      %75 = vector.load %arg3[%c0_40, %c0_41, %c0_42] : memref<1x8x32xf32, #tpu.memory_space<vmem>>, vector<1x8x32xf32>
      %c0_43 = arith.constant 0 : index
      %c0_44 = arith.constant 0 : index
      %76 = vector.load %arg6[%c0_43, %c0_44] : memref<1x32xf32, #tpu.memory_space<vmem>>, vector<1x32xf32>
      %c0_45 = arith.constant 0 : index
      %c0_46 = arith.constant 0 : index
      %77 = vector.load %arg7[%c0_45, %c0_46] : memref<1x32xf32, #tpu.memory_space<vmem>>, vector<1x32xf32>
      %cst_47 = arith.constant dense<0.000000e+00> : vector<1x8xf32>
      %78 = vector.multi_reduction <add>, %75, %cst_47 [2] : vector<1x8x32xf32> to vector<1x8xf32>
      %79 = vector.shape_cast %78 : vector<1x8xf32> to vector<1x8x1xf32>
      %cst_48 = arith.constant 3.200000e+01 : f32
      %80 = vector.broadcast %cst_48 : f32 to vector<1x8x1xf32>
      %81 = arith.divf %79, %80 : vector<1x8x1xf32>
      %82 = vector.broadcast %81 : vector<1x8x1xf32> to vector<1x8x32xf32>
      %83 = arith.subf %75, %82 : vector<1x8x32xf32>
      %84 = arith.mulf %83, %83 : vector<1x8x32xf32>
      %cst_49 = arith.constant dense<0.000000e+00> : vector<1x8xf32>
      %85 = vector.multi_reduction <add>, %84, %cst_49 [2] : vector<1x8x32xf32> to vector<1x8xf32>
      %86 = vector.shape_cast %85 : vector<1x8xf32> to vector<1x8x1xf32>
      %cst_50 = arith.constant 3.200000e+01 : f32
      %87 = vector.broadcast %cst_50 : f32 to vector<1x8x1xf32>
      %88 = arith.divf %86, %87 : vector<1x8x1xf32>
      %89 = vector.broadcast %81 : vector<1x8x1xf32> to vector<1x8x32xf32>
      %90 = arith.subf %75, %89 : vector<1x8x32xf32>
      %cst_51 = arith.constant 9.99999974E-6 : f32
      %91 = vector.broadcast %cst_51 : f32 to vector<1x8x1xf32>
      %92 = arith.addf %88, %91 : vector<1x8x1xf32>
      %93 = math.rsqrt %92 : vector<1x8x1xf32>
      %94 = vector.broadcast %93 : vector<1x8x1xf32> to vector<1x8x32xf32>
      %95 = arith.mulf %90, %94 : vector<1x8x32xf32>
      %96 = vector.shape_cast %76 : vector<1x32xf32> to vector<1x1x32xf32>
      %97 = vector.broadcast %96 : vector<1x1x32xf32> to vector<1x8x32xf32>
      %98 = arith.mulf %95, %97 : vector<1x8x32xf32>
      %99 = vector.shape_cast %77 : vector<1x32xf32> to vector<1x1x32xf32>
      %100 = vector.broadcast %99 : vector<1x1x32xf32> to vector<1x8x32xf32>
      %101 = arith.addf %98, %100 : vector<1x8x32xf32>
      %102 = arith.truncf %74 : vector<1x16x32xf32> to vector<1x16x32xbf16>
      %c0_52 = arith.constant 0 : index
      %c0_53 = arith.constant 0 : index
      %c0_54 = arith.constant 0 : index
      %103 = vector.load %arg12[%c0_52, %c0_53, %c0_54] : memref<1x24x32xbf16, #tpu.memory_space<vmem>>, vector<1x16x32xbf16>
      tpu.vector_store %arg12[%c0_52, %c0_53, %c0_54], %102 {strides = array<i32>} : memref<1x24x32xbf16, #tpu.memory_space<vmem>>, vector<1x16x32xbf16>,
      %104 = arith.truncf %101 : vector<1x8x32xf32> to vector<1x8x32xbf16>
      %c0_55 = arith.constant 0 : index
      %c16 = arith.constant 16 : index
      %c0_56 = arith.constant 0 : index
      %105 = vector.load %arg12[%c0_55, %c16, %c0_56] : memref<1x24x32xbf16, #tpu.memory_space<vmem>>, vector<1x8x32xbf16>
      tpu.vector_store %arg12[%c0_55, %c16, %c0_56], %104 {strides = array<i32>} : memref<1x24x32xbf16, #tpu.memory_space<vmem>>, vector<1x8x32xbf16>,
      %106 = arith.truncf %101 : vector<1x8x32xf32> to vector<1x8x32xbf16>
      %c0_57 = arith.constant 0 : index
      %c0_58 = arith.constant 0 : index
      %c0_59 = arith.constant 0 : index
      %107 = vector.load %arg13[%c0_57, %c0_58, %c0_59] : memref<1x8x32xbf16, #tpu.memory_space<vmem>>, vector<1x8x32xbf16>
      tpu.vector_store %arg13[%c0_57, %c0_58, %c0_59], %106 {strides = array<i32>} : memref<1x8x32xbf16, #tpu.memory_space<vmem>>, vector<1x8x32xbf16>,
      %cst_60 = arith.constant 0.000000e+00 : f32
      %108 = vector.broadcast %cst_60 : f32 to vector<8x32xf32>
      %c0_61 = arith.constant 0 : index
      %c0_62 = arith.constant 0 : index
      %109 = vector.load %arg14[%c0_61, %c0_62] : memref<8x32xf32, #tpu.memory_space<vmem>>, vector<8x32xf32>
      tpu.vector_store %arg14[%c0_61, %c0_62], %108 {strides = array<i32>} : memref<8x32xf32, #tpu.memory_space<vmem>>, vector<8x32xf32>,
    } else {
    }
    %c0 = arith.constant 0 : index
    %c0_1 = arith.constant 0 : index
    %c0_2 = arith.constant 0 : index
    %3 = vector.load %arg13[%c0, %c0_1, %c0_2] : memref<1x8x32xbf16, #tpu.memory_space<vmem>>, vector<1x8x32xbf16>
    %4 = vector.shape_cast %3 : vector<1x8x32xbf16> to vector<8x32xbf16>
    %c0_3 = arith.constant 0 : index
    %c0_4 = arith.constant 0 : index
    %c0_5 = arith.constant 0 : index
    %5 = vector.load %arg12[%c0_3, %c0_4, %c0_5] : memref<1x24x32xbf16, #tpu.memory_space<vmem>>, vector<1x24x32xbf16>
    %6 = vector.shape_cast %5 : vector<1x24x32xbf16> to vector<24x32xbf16>
    %c0_6 = arith.constant 0 : index
    %c0_7 = arith.constant 0 : index
    %c0_8 = arith.constant 0 : index
    %7 = vector.load %arg8[%c0_6, %c0_7, %c0_8] : memref<1x32x8xbf16, #tpu.memory_space<vmem>>, vector<1x32x8xbf16>
    %8 = vector.shape_cast %7 : vector<1x32x8xbf16> to vector<32x8xbf16>
    %cst = arith.constant dense<0.000000e+00> : vector<8x8xf32>
    %9 = tpu.matmul %4, %8, %cst {dimension_numbers = #tpu.dot_dimension_numbers<[1], [0], [0], [1], [0, 0, 1, 1], [], []>} : vector<8x32xbf16>, vector<32x8xbf16>, vector<8x8xf32> -> vector<8x8xf32>
    %c0_9 = arith.constant 0 : index
    %c0_10 = arith.constant 0 : index
    %c0_11 = arith.constant 0 : index
    %10 = vector.load %arg9[%c0_9, %c0_10, %c0_11] : memref<1x32x16xbf16, #tpu.memory_space<vmem>>, vector<1x32x16xbf16>
    %11 = vector.shape_cast %10 : vector<1x32x16xbf16> to vector<32x16xbf16>
    %cst_12 = arith.constant dense<0.000000e+00> : vector<24x16xf32>
    %12 = tpu.matmul %6, %11, %cst_12 {dimension_numbers = #tpu.dot_dimension_numbers<[1], [0], [0], [1], [0, 0, 1, 1], [], []>} : vector<24x32xbf16>, vector<32x16xbf16>, vector<24x16xf32> -> vector<24x16xf32>
    %cst_13 = arith.constant 0.353553385 : f32
    %13 = vector.broadcast %cst_13 : f32 to vector<8x8xf32>
    %14 = arith.mulf %9, %13 : vector<8x8xf32>
    %15 = arith.truncf %14 : vector<8x8xf32> to vector<8x8xbf16>
    %16 = vector.shape_cast %15 : vector<8x8xbf16> to vector<1x8x8xbf16>
    %17 = vector.extract_strided_slice %12 {offsets = [0, 0], sizes = [24, 8], strides = [1, 1]} : vector<24x16xf32> to vector<24x8xf32>
    %18 = arith.truncf %17 : vector<24x8xf32> to vector<24x8xbf16>
    %19 = vector.shape_cast %18 : vector<24x8xbf16> to vector<1x24x8xbf16>
    %20 = vector.extract_strided_slice %12 {offsets = [0, 8], sizes = [24, 8], strides = [1, 1]} : vector<24x16xf32> to vector<24x8xf32>
    %21 = arith.truncf %20 : vector<24x8xf32> to vector<24x8xbf16>
    %22 = vector.shape_cast %21 : vector<24x8xbf16> to vector<1x24x8xbf16>
    "tpu.trace_start"() <{level = 10 : i32, message = "bqd,bkd->bqk"}> : () -> ()
    %cst_14 = arith.constant dense<0.000000e+00> : vector<1x8x24xf32>
    %23 = tpu.matmul %16, %19, %cst_14 {dimension_numbers = #tpu.dot_dimension_numbers<[2], [2], [1], [1], [0, 0, 0, 1, 1, 1], [0], [0]>} : vector<1x8x8xbf16>, vector<1x24x8xbf16>, vector<1x8x24xf32> -> vector<1x8x24xf32>
    "tpu.trace_stop"() : () -> ()
    %cst_15 = arith.constant dense<0xFF800000> : vector<1x8xf32>
    %24 = vector.multi_reduction <maximumf>, %23, %cst_15 [2] : vector<1x8x24xf32> to vector<1x8xf32>
    %cst_16 = arith.constant 0xFF800000 : f32
    %25 = vector.broadcast %cst_16 : f32 to vector<1x8xf32>
    %26 = arith.maximumf %25, %24 : vector<1x8xf32>
    %27 = vector.shape_cast %26 : vector<1x8xf32> to vector<1x8x1xf32>
    %28 = vector.broadcast %27 : vector<1x8x1xf32> to vector<1x8x24xf32>
    %29 = arith.subf %23, %28 : vector<1x8x24xf32>
    %30 = math.exp %29 : vector<1x8x24xf32>
    %cst_17 = arith.constant dense<0.000000e+00> : vector<1x8xf32>
    %31 = vector.multi_reduction <add>, %30, %cst_17 [2] : vector<1x8x24xf32> to vector<1x8xf32>
    %32 = vector.shape_cast %31 : vector<1x8xf32> to vector<1x8x1xf32>
    %33 = vector.broadcast %32 : vector<1x8x1xf32> to vector<1x8x24xf32>
    %34 = arith.divf %30, %33 : vector<1x8x24xf32>
    %35 = arith.truncf %34 : vector<1x8x24xf32> to vector<1x8x24xbf16>
    "tpu.trace_start"() <{level = 10 : i32, message = "bqk,bkd->bqd"}> : () -> ()
    %cst_18 = arith.constant dense<0.000000e+00> : vector<1x8x8xf32>
    %36 = tpu.matmul %35, %22, %cst_18 {dimension_numbers = #tpu.dot_dimension_numbers<[2], [1], [1], [2], [0, 0, 0, 1, 1, 2], [0], [0]>} : vector<1x8x24xbf16>, vector<1x24x8xbf16>, vector<1x8x8xf32> -> vector<1x8x8xf32>
    "tpu.trace_stop"() : () -> ()
    %c0_19 = arith.constant 0 : index
    %c0_20 = arith.constant 0 : index
    %37 = vector.load %arg14[%c0_19, %c0_20] : memref<8x32xf32, #tpu.memory_space<vmem>>, vector<8x32xf32>
    %38 = arith.truncf %36 : vector<1x8x8xf32> to vector<1x8x8xbf16>
    %39 = vector.shape_cast %38 : vector<1x8x8xbf16> to vector<8x8xbf16>
    %c0_21 = arith.constant 0 : index
    %c0_22 = arith.constant 0 : index
    %c0_23 = arith.constant 0 : index
    %40 = vector.load %arg10[%c0_21, %c0_22, %c0_23] : memref<1x8x32xbf16, #tpu.memory_space<vmem>>, vector<1x8x32xbf16>
    %41 = vector.shape_cast %40 : vector<1x8x32xbf16> to vector<8x32xbf16>
    %cst_24 = arith.constant dense<0.000000e+00> : vector<8x32xf32>
    %42 = tpu.matmul %39, %41, %cst_24 {dimension_numbers = #tpu.dot_dimension_numbers<[1], [0], [0], [1], [0, 0, 1, 1], [], []>} : vector<8x8xbf16>, vector<8x32xbf16>, vector<8x32xf32> -> vector<8x32xf32>
    %43 = arith.addf %37, %42 : vector<8x32xf32>
    %c0_25 = arith.constant 0 : index
    %c0_26 = arith.constant 0 : index
    %44 = vector.load %arg14[%c0_25, %c0_26] : memref<8x32xf32, #tpu.memory_space<vmem>>, vector<8x32xf32>
    tpu.vector_store %arg14[%c0_25, %c0_26], %43 {strides = array<i32>} : memref<8x32xf32, #tpu.memory_space<vmem>>, vector<8x32xf32>,
    %c3_i32 = arith.constant 3 : i32
    %45 = arith.cmpi eq, %arg1, %c3_i32 : i32
    %46 = arith.extui %45 : i1 to i32
    %c0_i32_27 = arith.constant 0 : i32
    %47 = arith.cmpi ne, %46, %c0_i32_27 : i32
    scf.if %47 {
      %c0_28 = arith.constant 0 : index
      %c0_29 = arith.constant 0 : index
      %48 = vector.load %arg14[%c0_28, %c0_29] : memref<8x32xf32, #tpu.memory_space<vmem>>, vector<8x32xf32>
      %49 = vector.shape_cast %48 : vector<8x32xf32> to vector<1x8x32xf32>
      %c0_30 = arith.constant 0 : index
      %c0_31 = arith.constant 0 : index
      %c0_32 = arith.constant 0 : index
      %50 = vector.load %arg11[%c0_30, %c0_31, %c0_32] : memref<1x8x32xf32, #tpu.memory_space<vmem>>, vector<1x8x32xf32>
      tpu.vector_store %arg11[%c0_30, %c0_31, %c0_32], %49 {strides = array<i32>} : memref<1x8x32xf32, #tpu.memory_space<vmem>>, vector<1x8x32xf32>,
    } else {
    }
    return
  }
  func.func @transform_0(%arg0: i32, %arg1: i32) -> (i32, i32, i32) {
    %c0_i32 = arith.constant 0 : i32
    %c0_i32_0 = arith.constant 0 : i32
    %c0_i32_1 = arith.constant 0 : i32
    return %arg0, %c0_i32, %c0_i32_0 : i32, i32, i32
  }
  func.func @transform_1(%arg0: i32, %arg1: i32) -> (i32, i32, i32) {
    %c0_i32 = arith.constant 0 : i32
    %c0_i32_0 = arith.constant 0 : i32
    %c0_i32_1 = arith.constant 0 : i32
    return %arg0, %c0_i32, %c0_i32_0 : i32, i32, i32
  }
  func.func @transform_2(%arg0: i32, %arg1: i32) -> (i32, i32) {
    %c0_i32 = arith.constant 0 : i32
    %c0_i32_0 = arith.constant 0 : i32
    %c0_i32_1 = arith.constant 0 : i32
    return %c0_i32, %c0_i32_0 : i32, i32
  }
  func.func @transform_3(%arg0: i32, %arg1: i32) -> (i32, i32) {
    %c0_i32 = arith.constant 0 : i32
    %c0_i32_0 = arith.constant 0 : i32
    %c0_i32_1 = arith.constant 0 : i32
    return %c0_i32, %c0_i32_0 : i32, i32
  }
  func.func @transform_4(%arg0: i32, %arg1: i32) -> (i32, i32) {
    %c0_i32 = arith.constant 0 : i32
    %c0_i32_0 = arith.constant 0 : i32
    %c0_i32_1 = arith.constant 0 : i32
    return %c0_i32, %c0_i32_0 : i32, i32
  }
  func.func @transform_5(%arg0: i32, %arg1: i32) -> (i32, i32) {
    %c0_i32 = arith.constant 0 : i32
    %c0_i32_0 = arith.constant 0 : i32
    %c0_i32_1 = arith.constant 0 : i32
    return %c0_i32, %c0_i32_0 : i32, i32
  }
  func.func @transform_6(%arg0: i32, %arg1: i32) -> (i32, i32, i32) {
    %c0_i32 = arith.constant 0 : i32
    %c0_i32_0 = arith.constant 0 : i32
    %c0_i32_1 = arith.constant 0 : i32
    return %arg1, %c0_i32, %c0_i32_0 : i32, i32, i32
  }
  func.func @transform_7(%arg0: i32, %arg1: i32) -> (i32, i32, i32) {
    %c0_i32 = arith.constant 0 : i32
    %c0_i32_0 = arith.constant 0 : i32
    %c0_i32_1 = arith.constant 0 : i32
    return %arg1, %c0_i32, %c0_i32_0 : i32, i32, i32
  }
  func.func @transform_8(%arg0: i32, %arg1: i32) -> (i32, i32, i32) {
    %c0_i32 = arith.constant 0 : i32
    %c0_i32_0 = arith.constant 0 : i32
    %c0_i32_1 = arith.constant 0 : i32
    return %arg1, %c0_i32, %c0_i32_0 : i32, i32, i32
  }
  func.func @transform_9(%arg0: i32, %arg1: i32) -> (i32, i32, i32) {
    %c0_i32 = arith.constant 0 : i32
    %c0_i32_0 = arith.constant 0 : i32
    %c0_i32_1 = arith.constant 0 : i32
    return %arg0, %c0_i32, %c0_i32_0 : i32, i32, i32
  }
}

</mosaic_0001>

<bundles_post_ra>
// kernel: tpu_custom_call.1
= control target key start
LH: loop header
LB: loop body
LE: loop exit
PB: predicated region body
PF: predicated region fallthrough
CT: control target
= control target key end

     0   :  { %s1517_s0 = inlined_call_operand.vmem [shape: f32[2,16,32], index: 0, kind: input, shape index: {}]   ;;  %s1518_s1 = inlined_call_operand.vmem [shape: f32[2,8,32], index: 1, kind: input, shape index: {}]   ;;  %s1519_s2 = inlined_call_operand.vmem [shape: f32[1,32], index: 2, kind: input, shape index: {}]   ;;  %s1520_s3 = inlined_call_operand.vmem [shape: f32[1,32], index: 3, kind: input, shape index: {}]   ;;  %s1521_s4 = inlined_call_operand.vmem [shape: f32[1,32], index: 4, kind: input, shape index: {}]   ;;  %s1522_s5 = inlined_call_operand.vmem [shape: f32[1,32], index: 5, kind: input, shape index: {}]   ;;  %s1523_s6 = inlined_call_operand.vmem [shape: bf16[4,32,8], index: 6, kind: input, shape index: {}]   ;;  %s1524_s7 = inlined_call_operand.vmem [shape: bf16[4,32,16], index: 7, kind: input, shape index: {}]   ;;  %s1525_s8 = inlined_call_operand.vmem [shape: bf16[4,8,32], index: 8, kind: input, shape index: {}]   ;;  %s1526_s9 = inlined_call_operand.hbm [shape: f32[2,8,32], index: 9, kind: output, shape index: {}]  }
   0x1   :  { %1540 = sst [smem:[#allocation19_spill]] %s1526_s9 }
   0x2   :  { %14 = vsyncpa [#allocation6], 0 }
   0x3   :  { %16 = vsyncpa [#allocation6 + $0x1], 0  ;;  %s1305_s30 = smov 0   ;;  %s1307_s10 = smov 0  }
   0x4   :  { %s1309_s11 = smov 0   ;;  %s1311_s12 = smov 0  }
   0x5   :  { %s1313_s13 = smov 0   ;;  %s1315_s14 = smov 0  }
   0x6   :  { %s1317_s15 = smov 0   ;;  %s1319_s16 = smov 0  }
   0x7 LB: > { %1541 = sst [smem:[#allocation8_spill]] %s1220_s30  ;;  %s967_s17 = sadd.s32 4294967295, %s1248_s16   ;;  %s1248_s16 = sphi %s1319_s16, %s22_s16   ;;  %s1244_s15 = sphi %s1317_s15, %s1567_s15   ;;  %s1240_s14 = sphi %s1315_s14, %s1566_s14   ;;  %s1236_s13 = sphi %s1313_s13, %s1565_s13   ;;  %s1232_s12 = sphi %s1311_s12, %s1564_s12   ;;  %s1228_s11 = sphi %s1309_s11, %s1563_s11   ;;  %s1224_s10 = sphi %s1307_s10, %s1562_s10   ;;  %s1220_s30 = sphi %s1305_s30, %s1561_s30  }
   0x8   : > { %1542 = sst [smem:[#allocation9_spill]] %s1224_s10  ;;  %s968_s18 = sadd.s32 4294967294, %s1248_s16  }
   0x9   : > { %1543 = sst [smem:[#allocation10_spill]] %s1228_s11  ;;  %s31_s19 = sadd.s32 1, %s1240_s14 }
   0xa   : > { %1544 = sst [smem:[#allocation11_spill]] %s1240_s14  ;;  %p32_p0 = scmp.ge.s32.totalorder %s31_s19, 4 }
   0xb   : > { %1545 = sst [smem:[#allocation12_spill]] %s1244_s15  ;;  %s34_s20 = sadd.s32 1, %s1244_s15 }
   0xc   : > { %1546 = sst [smem:[#allocation13_spill]] %s1248_s16  ;;  %p265_p1 = scmp.ne.s32.totalorder %s1228_s11, %s1224_s10 }
   0xd   : > { %p266_p2 = scmp.eq.s32.totalorder %s967_s17, 7  ;;  %s1569_s19 = smov (%p32_p0, %s31_s19), 0 }
   0xe   : > { %1547 = sst [smem:[#allocation14_spill]] %s1569_s19  ;;  %s1571_s20 = smov (!%p32_p0, %s34_s20), %s1244_s15 }
   0xf   : > { %p1354_p3 = por %p266_p2, %p265_p1  ;;  %p271_p4 = scmp.ne.s32.totalorder %s1224_s10, %s1220_s30 }
  0x10   : > { %p36_p5 = scmp.ge.s32.totalorder %s1571_s20, 2  ;;  %p272_p6 = scmp.eq.s32.totalorder %s968_s18, 7 }
  0x11   : > { %s1548_s21 = scalar_select %p1354_p3, 1, 0 }
  0x12   : > { %p971_p7 = scmp.ge.s32.totalorder %s1248_s16, 1  ;;  %p340_p8 = scmp.lt.s32.totalorder %s1248_s16, 9 }
  0x13   : > { %1549 = sst [smem:[#allocation15_spill]] %s1548_s21  ;;  %s1573_s20 = smov (%p36_p5, %s1571_s20), 0 }
  0x14   : > { %1550 = sst [smem:[#allocation16_spill]] %s1573_s20  ;;  %p1364_p9 = por %p272_p6, %p271_p4 }
  0x15   : > { %p341_p10 = pnand %p971_p7, %p340_p8  ;;  %s252_s23 = ssub.s32 %s1244_s15, %s1573_s20 }
  0x16   : > { %s1551_s22 = scalar_select %p1364_p9, 1, 0 }
  0x17   : > { %s255_s24 = sadd.s32 1, %s1228_s11  ;;  %p253_p11 = scmp.eq.s32.totalorder %s252_s23, 0 }
  0x18   : > { %1552 = sst [smem:[#allocation17_spill]] %s1551_s22  ;;  %344 = sbr.rel (%p341_p10) target bundleno = 1589 (0x635), region = 56 }
  0x19   : > { %s1372_s25 = scalar_select %p253_p11, %s1228_s11, %s255_s24  }
  0x1a   : > { %s1533_s26 = sand.u32 (!%p341_p10), 1, %s1224_s10   ;;  %p394_p12 = scmp.lt.s32.totalorder (!%p341_p10), %s1236_s13, 1 }
  0x1b   : > { %1553 = sst [smem:[#allocation18_spill]] %s1372_s25  ;;  %s1378_s27 = sshll.u32 (!%p341_p10), %s1533_s26, 3 }
  0x1c   : > { %p403_p13 = scmp.lt.s32.totalorder (!%p341_p10), %s1232_s12, 3  ;;  %s393_s23 = scalar_lea.vmem (!%p341_p10), [#allocation5], %s1378_s27 }
  0x1d   : > { %p981_p0 = scmp.ne.s32.totalorder (!%p341_p10), %s1232_s12, 0 }
  0x1f   : > { %s395_s28 = scalar_select %p394_p12, %s1236_s13, 1 }
  0x20   : > { %s404_s29 = scalar_select %p403_p13, %s1232_s12, 3 }
  0x21   : > { %s1005_s17 = sshll.u32 %s395_s28, 4  ;;  %s975_s18 = sshll.u32 %s395_s28, 3  ;;  %vm426_vm0 = vcmask (!%p981_p0), 261120   ;;  %v1250_v4 = vmov (!%p981_p0), 0.0   ;;  %v982_v32 = vld [vmem:[%s1519_s2] ss:$0 sm:$0xff] (!%p981_p0) }
  0x22   : > { %s398_s20 = scalar_lea.vmem %s1517_s0, %s1005_s17  ;;  %s402_s14 = scalar_lea.vmem %s1518_s1, %s975_s18  ;;  %514 = vst.msk [vmem:[#allocation4] sm:$0xff] (!%p981_p0), %vm426_vm0, %v1250_v4  ;;  %v983_v34 = vld [vmem:[%s1520_s3] ss:$0 sm:$0xff] (!%p981_p0)  ;;  %vm508_vm1 = vcmask (!%p981_p0), 257024  }
  0x23   : > { %s1006_s25 = sshll.u32 %s404_s29, 4  ;;  %s980_s11 = sshll.u32 %s404_s29, 2  ;;  %v422_v0 = vld [vmem:[%s398_s20] sm:$0xff] (!%p981_p0)  ;;  %v423_v2 = vld [vmem:[%s398_s20 + $0x8] sm:$0xff] (!%p981_p0) }
  0x24   : > { %s1392_s26 = scalar_lea.vmem %s1523_s6, %s1006_s25  ;;  %s1397_s21 = scalar_lea.vmem %s1524_s7, %s1006_s25  ;;  %v470_v1 = vld [vmem:[%s402_s14] sm:$0xff] (!%p981_p0)  ;;  %v427_v3 = vsel (!%p981_p0), %vm426_vm0, %v422_v0, 0.0  ;;  %v430_v6 = vsel (!%p981_p0), %vm426_vm0, %v423_v2, 0.0 }
  0x25   : > { %s1402_s17 = scalar_lea.vmem %s1525_s8, %s980_s11  ;;  %421 = sbr.rel (%p981_p0) target bundleno = 357 (0x165), region = 60  ;;  %v473_v5 = vsel (!%p981_p0), %vm426_vm0, %v470_v1, 0.0  ;;  %428 = vadd.xlane.f32.xlu0 (!%p981_p0), %v427_v3  ;;  %v984_v37 = vld [vmem:[%s1521_s4] ss:$0 sm:$0xff] (!%p981_p0) }
  0x26   : > { %474 = vadd.xlane.f32.xlu1 (!%p981_p0), %v473_v5  ;;  %v985_v41 = vld [vmem:[%s1522_s5] ss:$0 sm:$0xff] (!%p981_p0) }
  0x29   : > { %431 = vadd.xlane.f32.xlu0 (!%p981_p0), %v430_v6 }
  0xb2   : > { %v429_v7 = vpop.xlane.xlu0 %428 }
  0xb3   : > { %v475_v8 = vpop.xlane.xlu1 %474  ;;  %v434_v9 = vmul.f32 0.03125, %v429_v7 }
  0xb4   : > { %v476_v10 = vmul.f32 0.03125, %v475_v8 }
  0xb5   : > { %v436_v11 = vsub.f32 %v422_v0, %v434_v9 }
  0xb6   : > { %v477_v12 = vsub.f32 %v470_v1, %v476_v10  ;;  %v432_v13 = vpop.xlane.xlu0 %431 }
  0xb7   : > { %v435_v14 = vmul.f32 0.03125, %v432_v13  ;;  %v438_v15 = vmul.f32 %v436_v11, %v436_v11 }
  0xb8   : > { %v478_v16 = vmul.f32 %v477_v12, %v477_v12 }
  0xb9   : > { %v437_v17 = vsub.f32 %v423_v2, %v435_v14  ;;  %v440_v18 = vsel %vm426_vm0, %v438_v15, 0.0 }
  0xba   : > { %441 = vadd.xlane.f32.xlu1 %v440_v18  ;;  %v479_v19 = vsel %vm426_vm0, %v478_v16, 0.0 }
  0xbb   : > { %v439_v20 = vmul.f32 %v437_v17, %v437_v17 }
  0xbd   : > { %v443_v21 = vsel %vm426_vm0, %v439_v20, 0.0 }
  0xbe   : > { %480 = vadd.xlane.f32.xlu1 %v479_v19  ;;  %444 = vadd.xlane.f32.xlu0 %v443_v21 }
 0x147   : > { %v442_v22 = vpop.xlane.xlu1 %441 }
 0x148   : > { %v446_v23 = vmul.f32 0.03125, %v442_v22 }
 0x14a   : > { %v448_v24 = vadd.f32 1e-05, %v446_v23 }
 0x14b   : > { %v481_v25 = vpop.xlane.xlu1 %480  ;;  %v445_v26 = vpop.xlane.xlu0 %444 }
 0x14c   : > { %1138 = vrsqrt.f32 %v448_v24  ;;  %v482_v27 = vmul.f32 0.03125, %v481_v25  ;;  %v447_v28 = vmul.f32 0.03125, %v445_v26 }
 0x14e   : > { %v483_v29 = vadd.f32 1e-05, %v482_v27  ;;  %v449_v30 = vadd.f32 1e-05, %v447_v28 }
 0x150   : > { %1140 = vrsqrt.f32 %v483_v29 }
 0x151   : > { %1142 = vrsqrt.f32 %v449_v30 }
 0x156   : > { %v1139_v31 = vpop.eup %1138 }
 0x157   : > { %v452_v33 = vmul.f32 %v1139_v31, %v436_v11 }
 0x159   : > { %v460_v35 = vmul.f32 %v982_v32, %v452_v33 }
 0x15a   : > { %v1141_v36 = vpop.eup %1140 }
 0x15b   : > { %v1143_v38 = vpop.eup %1142  ;;  %v468_v39 = vadd.f32 %v983_v34, %v460_v35  ;;  %v485_v40 = vmul.f32 %v1141_v36, %v477_v12 }
 0x15c   : > { %v453_v42 = vmul.f32 %v1143_v38, %v437_v17 }
 0x15d   : > { %v1008_v43 = vpack.c.bf16 %v468_v39, %v468_v39  ;;  %v492_v44 = vmul.f32 %v984_v37, %v485_v40 }
 0x15e   : > { %v461_v45 = vmul.f32 %v982_v32, %v453_v42 }
 0x15f   : > { %509 = vst.msk [vmem:[#allocation2] sm:$0xf] %vm508_vm1, %v1008_v43  ;;  %v499_v46 = vadd.f32 %v985_v41, %v492_v44 }
 0x160   : > { %v469_v47 = vadd.f32 %v983_v34, %v461_v45 }
 0x161   : > { %v511_v48 = vpack.c.bf16 %v499_v46, %v499_v46 }
 0x162   : > { %v1009_v49 = vpack.c.bf16 %v469_v47, %v469_v47 }
 0x163   : > { %512 = vst.msk [vmem:[#allocation2 + $0x8] sm:$0xf] %vm508_vm1, %v511_v48  ;;  %513 = vst.msk [vmem:[#allocation3] sm:$0xf] %vm508_vm1, %v511_v48 }
 0x164   : > { %510 = vst.msk [vmem:[#allocation2 + $0x4] sm:$0xf] %vm508_vm1, %v1009_v49 }
 0x165 PF: > { %v1144_v50 = vld [vmem:[%s1397_s21] sm:$0xff]   ;;  %vm535_vm2 = vcmask 261120   ;;  %v1145_v51 = vld [vmem:[%s1397_s21 + $0x8] sm:$0xff]   ;;  %v1251_v53 = vmov 0.0   ;;  %vm1252_vm3 = vmmov 0   ;;  %vm661_vm4 = vcmask 64512  }
 0x166   : > { %1033 = vmatprep.subr.bf16.mxu1 %v1144_v50  ;;  %1025 = vmatprep.subr.bf16.mxu0 %v1251_v53  ;;  %v1148_v54 = vld [vmem:[%s1392_s26] sm:$0xff]   ;;  %v1149_v56 = vld [vmem:[%s1392_s26 + $0x8] sm:$0xff]   ;;  %s1253_s20 = smov 120   ;;  %vm734_vm5 = vcmask 1043456   ;;  %vm711_vm6 = vcmask 195584   ;;  %v778_v32 = vld [vmem:[#allocation4] sm:$0xff] }
 0x167   : > { %1034 = vmatpush3.bf16.msra.mxu1 %v1144_v50  ;;  %1029 = vmatprep.mubr.msk.bf16.mxu0 %vm1252_vm3, %v1251_v53  ;;  %v780_v23 = vld [vmem:[%s1402_s17] sm:$0xf]  ;;  %p1000_p1 = scmp.ne.s32.totalorder %s1232_s12, 3 }
 0x168   : > { %1035 = vmatprep.subr.bf16.mxu1 %v1145_v51  ;;  %1026 = vmatpush3.bf16.msra.mxu0 %v1148_v54  ;;  %v785_v25 = vsel %vm734_vm5, %v780_v23, 0 }
 0x169   : > { %1027 = vmatprep.subr.bf16.mxu0 %v1251_v53 }
 0x16a   : > { %v1147_v55 = vld [vmem:[#allocation2 + $0x8] ss:$0 sps:$4 sm:$0xff]   ;;  %v515_v57 = vld [vmem:[#allocation3] sm:$0xf] }
 0x16b   : > { %v1146_v52 = vld [vmem:[#allocation2] sm:$0xff]   ;;  %1036 = vmatpush3.bf16.msra.mxu1 %v1145_v51 }
 0x16c   : > { %1037 = vmatprep.mubr.msk.bf16.mxu1 %vm535_vm2, %v1146_v52  ;;  %1049 = vmatprep.subr.bf16.mxu1 %v1251_v53 }
 0x16d   : > { %1028 = vmatpush3.bf16.msra.mxu0 %v1149_v56 }
 0x16e   : > { %1038 = vmatmul.mubr.msk.bf16.vlgmr.msra.gmra.mrb[0].mxu1 %vm535_vm2, %v1147_v55  ;;  %1041 = vmatprep.subr.bf16.mxu0 %v1251_v53 }
 0x16f   : > { %1053 = vmatprep.mubr.msk.bf16.mxu1 %vm1252_vm3, %v1251_v53 }
 0x170   : > { %1030 = vmatmul.mubr.msk.bf16.vlgmr.msra.gmra.mrb[0].mxu0 %vm535_vm2, %v515_v57 }
 0x171   : > { %1045 = vmatprep.mubr.msk.bf16.mxu0 %vm1252_vm3, %v1251_v53 }
 0x241   : > { %v1039_v58 = vpop.f32.mrb[0].mxu1 }
 0x242   : > { %v643_v59 = vpop.f32.mrb[1].mxu1  ;;  %v660_v4 = vpack.c.bf16 %v1039_v58, %v1039_v58 }
 0x243   : > { %v1040_v60 = vpop.f32.mrb[2].mxu1  ;;  %v573_v62 = vpop.f32.mrb[0].mxu0 }
 0x244   : > { %v646_v61 = vpop.f32.mrb[3].mxu1  ;;  %v1031_v0 = vpop.f32.mrb[1].mxu0  ;;  %v669_v5 = vsel %vm661_vm4, %v660_v4, 0  ;;  %v657_v6 = vmul.f32 0.35355338, %v573_v62 }
 0x245   : > { %v659_v63 = vpack.c.bf16 %v646_v61, %v643_v59  ;;  %v576_v1 = vpop.f32.mrb[2].mxu0 }
 0x246   : > { %v1032_v3 = vpop.f32.mrb[3].mxu0  ;;  %v658_v7 = vpack.c.bf16 %v657_v6, %v657_v6 }
 0x247   : > { %v666_v2 = vsel %vm661_vm4, %v659_v63, 0  ;;  %726 = vrot.lane.b32.xlu1 %v659_v63, %s1253_s20 }
 0x248   : > { %1042 = vmatpush3.bf16.xpose.msra.mxu0 %v666_v2 }
 0x249   : > { %1043 = vmatprep.subr.bf16.mxu0 %v1251_v53 }
 0x24b   : > { %728 = vrot.lane.b32.xlu1 %v660_v4, %s1253_s20 }
 0x250   : > { %1044 = vmatpush3.bf16.xpose.msra.mxu0 %v669_v5 }
 0x257   : > { %1046 = vmatmul.mubr.msk.bf16.vlgmr.msra.gmra.mrb[4].mxu0 %vm661_vm4, %v658_v7 }
 0x2b9   : > { %v727_v8 = vpop.permute.xlu1 %726 }
 0x2ba   : > { %1050 = vmatpush3.bf16.msra.mxu1 %v727_v8 }
 0x2bb   : > { %1051 = vmatprep.subr.bf16.mxu1 %v1251_v53 }
 0x2bd   : > { %v729_v9 = vpop.permute.xlu1 %728 }
 0x2be   : > { %v736_v10 = vsel %vm734_vm5, %v729_v9, 0 }
 0x2bf   : > { %1052 = vmatpush3.bf16.msra.mxu1 %v736_v10 }
 0x2c0   : > { %1057 = vmatprep.subr.bf16.mxu1 %v1251_v53 }
 0x32a   : > { %v705_v11 = vpop.f32.mrb[4].mxu0 }
 0x32b   : > { %v1047_v12 = vpop.f32.mrb[5].mxu0  ;;  %v712_v13 = vsel %vm711_vm6, %v705_v11, -inf }
 0x32c   : > { %713 = vmax.xlane.f32.xlu0 %v712_v13  ;;  %v708_v14 = vpop.f32.mrb[6].mxu0 }
 0x32d   : > { %v1048_v15 = vpop.f32.mrb[7].mxu0 }
 0x3b9   : > { %v714_v16 = vpop.xlane.xlu0 %713 }
 0x3ba   : > { %v715_v17 = vsub.f32 %v705_v11, %v714_v16 }
 0x3bc   : > { %v716_v18 = vmul.f32 1.442695, %v715_v17 }
 0x3be   : > { %1150 = vpow2.f32 %v716_v18 }
 0x3c8   : > { %v1151_v19 = vpop.eup %1150 }
 0x3c9   : > { %v718_v20 = vsel %vm711_vm6, %v1151_v19, 0.0 }
 0x3ca   : > { %719 = vadd.xlane.f32.xlu0 %v718_v20 }
 0x457   : > { %v720_v21 = vpop.xlane.xlu0 %719 }
 0x458   : > { %1152 = vrcp.f32 %v720_v21 }
 0x462   : > { %v1153_v22 = vpop.eup %1152 }
 0x463   : > { %v722_v24 = vmul.f32 %v1153_v22, %v1151_v19 }
 0x465   : > { %v723_v26 = vpack.c.bf16 %v722_v24, %v722_v24 }
 0x467   : > { %1054 = vmatmul.mubr.msk.bf16.vlgmr.msra.gmra.mrb[4].mxu1 %vm711_vm6, %v723_v26 }
 0x468   : > { %1058 = vmatpush3.bf16.msra.mxu1 %v785_v25  ;;  %1059 = vmatprep.mubr.msk.bf16.mxu1 %vm1252_vm3, %v1251_v53 }
 0x53a   : > { %v772_v27 = vpop.f32.mrb[4].mxu1 }
 0x53b   : > { %v779_v28 = vpack.c.bf16 %v772_v27, %v772_v27  ;;  %v1055_v29 = vpop.f32.mrb[5].mxu1 }
 0x53c   : > { %v775_v30 = vpop.f32.mrb[6].mxu1 }
 0x53d   : > { %v1056_v31 = vpop.f32.mrb[7].mxu1  ;;  %1060 = vmatmul.mubr.msk.bf16.vlgmr.msra.gmra.mrb[8].mxu1 %vm661_vm4, %v779_v28 }
 0x60d   : > { %832 = sbr.rel (%p1000_p1) target bundleno = 1564 (0x61c), region = 64 }
 0x610   : > { %v821_v33 = vpop.f32.mrb[8].mxu1 }
 0x611   : > { %v827_v34 = vadd.f32 %v821_v33, %v778_v32  ;;  %v1061_v35 = vpop.f32.mrb[9].mxu1 }
 0x612   : > { %v824_v36 = vpop.f32.mrb[10].mxu1 }
 0x613   : > { %828 = vst.msk [vmem:[#allocation4] sm:$0xff] %vm535_vm2, %v827_v34  ;;  %v1062_v37 = vpop.f32.mrb[11].mxu1 }
 0x61a   : > { %v833_v38 = vld [vmem:[#allocation4] sm:$0xff] }
 0x61b   : > { %834 = vst.msk [vmem:[%s393_s23] sm:$0xff] %vm535_vm2, %v833_v38 }
 0x61c PF: > { %s1554_s21 = sld [smem:[#allocation9_spill]]  ;;  %s1002_s25 = sshll.u32 %s1236_s13, 7 }
 0x61d   : > { %s1556_s18 = sld [smem:[#allocation19_spill]]  ;;  %s849_s28 = sshll.u32 %s393_s23, 4  ;;  %s850_s28 = int_to_ptr.vmem [resolvable:$true] %s849_s28 }
 0x61e   : > { %s1154_s9 = scalar_lea.vmem %s850_s28, 128  ;;  %s1254_s30 = smov [#allocation5]  }
 0x61f   : > { %p1155_p2 = scmp.ne.s32.totalorder %s850_s28, %s1154_s9  ;;  %s1158_s10 = sshll.u32 %s1254_s30, 4  ;;  %s1159_s10 = int_to_ptr.vmem [resolvable:$false] %s1158_s10 }
 0x620   : > { %s1160_s11 = scalar_lea.vmem %s1159_s10, 256  ;;  %p1161_p6 = scmp.lt.s32.totalorder %s850_s28, %s1159_s10 }
 0x621   : > { %p1156_p4 = pnand %p1155_p2, %p1354_p3  ;;  %p1162_p7 = scmp.lt.s32.totalorder %s1160_s11, %s1154_s9 }
 0x622   : > { %s1557_s12 = sand.u32 1, %s1554_s21  }
 0x623   : > { %s1466_s24 = scalar_lea.hbm %s1556_s18, %s1002_s25  ;;  %s836_s17 = scalar_lea.sflag [#allocation6], %s1557_s12 }
 0x624   : > { %p1157_p5 = pneg %p1156_p4  ;;  %p1163_p8 = por %p1162_p7, %p1161_p6 }
 0x626   : > { %p1164_p10 = pnand %p1163_p8, %p1157_p5 }
 0x628   : > { %1167 = shalt.err (!%p1164_p10)
}
 0x629   : > { %s1168_s13 = scalar_lea.hbm %s1466_s24, 128  ;;  %s1172_s14 = scalar_lea.hbm %s1556_s18, 256 }
 0x62a   : > { %p1169_p11 = scmp.ne.s32.totalorder %s1466_s24, %s1168_s13  ;;  %p1173_p0 = scmp.lt.u32.totalorder %s1466_s24, %s1556_s18 }
 0x62b   : > { %p1174_p1 = scmp.lt.u32.totalorder %s1172_s14, %s1168_s13  ;;  %p1176_p4 = scmp.lt.u32.totalorder %s1168_s13, %s1466_s24 }
 0x62c   : > { %p1170_p12 = pnand %p1169_p11, %p1354_p3 }
 0x62d   : > { %p1175_p2 = por %p1174_p1, %p1173_p0 }
 0x62e   : > { %p1171_p13 = pneg %p1170_p12 }
 0x62f   : > { %p1177_p5 = por %p1176_p4, %p1175_p2 }
 0x631   : > { %p1178_p6 = pnand %p1177_p5, %p1171_p13 }
 0x633   : > { %1181 = shalt.err (!%p1178_p6)
}
 0x634   : > { %1063 = dma.vmem_to_hbm [thread:$0]  (%p1354_p3), %s850_s28, 128, %s1466_s24, %s836_s17  }
 0x635 PF: > { %s1558_s19 = sld [smem:[#allocation13_spill]]  ;;  %s1559_s20 = sld [smem:[#allocation8_spill]] }
 0x63b   : > { %p1069_p7 = scmp.ge.s32.totalorder %s1558_s19, 2  ;;  %s861_s25 = sand.u32 1, %s1559_s20  }
 0x63c   : > { %s862_s26 = scalar_lea.sflag [#allocation6], %s861_s25 }
 0x63d   : > { %p1066_p8 = pnand %p1069_p7, %p1364_p9 }
 0x63f   : > { %1215 = dma.done.wait (!%p1066_p8), %s862_s26, 128  }
 0x640   : > { %1217 = vsyncadd (!%p1066_p8), %s862_s26, 4294967168  ;;  %s22_s16 = sadd.s32 1, %s1558_s19   ;;  %s1561_s30 = sld [smem:[#allocation9_spill]] }
 0x641   : > { %p19_p10 = scmp.ge.s32.totalorder %s22_s16, 10   ;;  %s1562_s10 = sld [smem:[#allocation10_spill]] }
 0x642   : > { %s1563_s11 = sld [smem:[#allocation18_spill]]  ;;  %s1564_s12 = sld [smem:[#allocation11_spill]] }
 0x643   : > { %s1565_s13 = sld [smem:[#allocation12_spill]]  ;;  %s1566_s14 = sld [smem:[#allocation14_spill]] }
 0x644   : > { %s1567_s15 = sld [smem:[#allocation16_spill]]  ;;  %21 = sbr.rel (!%p19_p10) target bundleno = 7 (0x7), region = 111 }
 0x64b   :  { %867 = vsyncpa [#allocation6], 1 }
 0x64c   :  { %869 = vsyncpa [#allocation6 + $0x1], 1 }

</bundles_post_ra>
